<compile_context>
chip_gen: v7x
topology: tpu7x:2x2x1
jax: 0.10.0
libtpu: 0.0.40
codegen_flags: <defaults>
</compile_context>

<pallas_src>
import functools

import jax
import jax.numpy as jnp
import numpy as np
from jax.experimental import pallas as pl
from jax.experimental.pallas import tpu as pltpu

EPS = 1e-5


# ----------------------------- Pallas kernel --------------------------------

def _conv_block_kernel(xp_ref, w1_ref, g1_ref, be1_ref, w2_ref, g2_ref, be2_ref,
                       p_ref, o_ref, pad2_ref, *, width):
    """Fully fused ConvBlock in a lane-dense (rows=(n,h), lanes=(w,c)) layout.

    xp_ref  : (N, H+2, W*Cin)    H-zero-padded input
    w1_ref  : (3, W*Cin, W*Cout) banded conv1 weights (one band matrix per kh tap)
    w2_ref  : (3, W*Cout, W*Cout) banded conv2 weights
    g*/be*  : (1, W*Cout)        BN gamma / beta, tiled over w
    p_ref   : (W*Cout, W*Cout)   tiled-identity matrix: per-channel sum + broadcast
    o_ref   : (N, H, W*Cout)     output
    pad2_ref: (N, H+2, W*Cout)   VMEM scratch for the H-padded layer-2 input
    """
    N, Hp, _ = xp_ref.shape
    H = Hp - 2
    WC = o_ref.shape[-1]
    inv_m = 1.0 / (N * H * width)          # 1 / (N*H*W) for full-batch BN stats

    def conv3x3(src_ref, band_ref):
        # SAME 3x3 conv as 3 accumulated MXU matmuls (one per kh tap).  The kw taps
        # and the W-direction zero padding are folded into the banded weight matrix,
        # so each matmul is (N*H, W*Cin) @ (W*Cin, W*Cout) with a 128-lane output.
        cin_lanes = src_ref.shape[-1]
        acc = jnp.zeros((N * H, WC), jnp.float32)
        for dh in range(3):
            rows = src_ref[:, dh:dh + H, :].reshape(N * H, cin_lanes)
            acc = acc + jnp.dot(rows, band_ref[dh],
                                preferred_element_type=jnp.float32)
        return acc

    def bn_relu(y, gamma, beta):
        # Training-mode BatchNorm2d: full-batch biased stats over (N, H, W).
        # Per-channel reduce + broadcast across the w-tiled lanes is one
        # (1, WC) @ (WC, WC) matmul with the tiled-identity matrix P.
        p = p_ref[...]
        mean = jnp.dot(jnp.sum(y, axis=0, keepdims=True), p,
                       preferred_element_type=jnp.float32) * inv_m
        d = y - mean
        var = jnp.dot(jnp.sum(d * d, axis=0, keepdims=True), p,
                      preferred_element_type=jnp.float32) * inv_m
        yhat = d * jax.lax.rsqrt(var + EPS)
        return jnp.maximum(yhat * gamma + beta, 0.0)

    # ---- layer 1: conv -> BN -> ReLU (conv bias omitted: cancels under BN) ----
    y1 = bn_relu(conv3x3(xp_ref, w1_ref), g1_ref[...], be1_ref[...])

    # H-pad the layer-2 input entirely in VMEM (never touches HBM).  Only the two
    # boundary rows need zeroing; the interior rows are fully overwritten.
    pad2_ref[:, 0:1, :] = jnp.zeros((N, 1, WC), jnp.float32)
    pad2_ref[:, H + 1:H + 2, :] = jnp.zeros((N, 1, WC), jnp.float32)
    pad2_ref[:, 1:H + 1, :] = y1.reshape(N, H, WC)

    # ---- layer 2: conv -> BN -> ReLU ----
    y2 = bn_relu(conv3x3(pad2_ref, w2_ref), g2_ref[...], be2_ref[...])
    o_ref[...] = y2.reshape(N, H, WC)


# ------------------------------ Wrapper --------------------------------------

def _band_matrices(w_hwio, width):
    """Fold the kw taps + W-direction SAME zero padding into 3 banded matrices.

    w_hwio: (3, 3, Cin, Cout) ->  B: (3, W*Cin, W*Cout) with
    B[kh, wi*Cin+ci, wo*Cout+co] = w_hwio[kh, wi-wo+1, ci, co] for |wi-wo| <= 1, else 0.
    """
    _, _, cin, cout = w_hwio.shape
    sel = np.zeros((3, width, width), np.float32)       # sel[dw, wi, wo]
    for dw in range(3):
        for wo in range(width):
            wi = wo + dw - 1
            if 0 <= wi < width:
                sel[dw, wi, wo] = 1.0
    band = jnp.einsum("dwio,wab->daibo",
                      w_hwio.astype(jnp.float32), jnp.asarray(sel),
                      precision=jax.lax.Precision.HIGHEST)
    return band.reshape(3, width * cin, width * cout)


def _full_spec(shape):
    nd = len(shape)
    return pl.BlockSpec(shape, lambda i, _nd=nd: (0,) * _nd)


def conv_block_forward(x_nchw, params):
    """params = [(w, b, gamma, beta), (w, b, gamma, beta)], PyTorch layouts."""
    (w1, _b1, g1, bt1), (w2, _b2, g2, bt2) = params
    N, Cin, H, W = x_nchw.shape
    Cout = w1.shape[0]
    WCin, WC = W * Cin, W * Cout

    # NCHW -> (N, H, W*Cin) with lane index w*Cin + ci, then zero-pad H only
    # (W-direction padding lives inside the banded weight matrices).
    x = jnp.transpose(x_nchw, (0, 2, 3, 1)).astype(jnp.float32).reshape(N, H, WCin)
    xp = jnp.pad(x, ((0, 0), (1, 1), (0, 0)))

    # PyTorch (Cout, Cin, kh, kw) -> HWIO -> banded (3, W*Cin, W*Cout).
    w1_band = _band_matrices(jnp.transpose(w1, (2, 3, 1, 0)), W)
    w2_band = _band_matrices(jnp.transpose(w2, (2, 3, 1, 0)), W)
    # Conv biases _b1/_b2 are not passed: a per-channel constant added before
    # training-mode BatchNorm cancels exactly when the batch mean is subtracted.

    # Tiled-identity matrix: per-channel sum over w + broadcast back, in one matmul.
    p = jnp.asarray(np.tile(np.eye(Cout, dtype=np.float32), (W, W)))

    def tile_wc(v):
        return jnp.tile(v.astype(jnp.float32).reshape(1, Cout), (1, W))

    g1t, be1t = tile_wc(g1), tile_wc(bt1)
    g2t, be2t = tile_wc(g2), tile_wc(bt2)

    kernel = functools.partial(_conv_block_kernel, width=W)

    y = pl.pallas_call(
        kernel,
        out_shape=jax.ShapeDtypeStruct((N, H, WC), jnp.float32),
        grid=(1,),
        in_specs=[
            _full_spec((N, H + 2, WCin)),
            _full_spec((3, WCin, WC)),
            _full_spec((1, WC)),
            _full_spec((1, WC)),
            _full_spec((3, WC, WC)),
            _full_spec((1, WC)),
            _full_spec((1, WC)),
            _full_spec((WC, WC)),
        ],
        out_specs=_full_spec((N, H, WC)),
        scratch_shapes=[pltpu.VMEM((N, H + 2, WC), jnp.float32)],
        compiler_params=pltpu.CompilerParams(
            dimension_semantics=("arbitrary",)),
    )(xp, w1_band, g1t, be1t, w2_band, g2t, be2t, p)

    # (N, H, W*Cout) -> NCHW
    return jnp.transpose(y.reshape(N, H, W, Cout), (0, 3, 1, 2))


# ------------------------------ Reference -------------------------------------

def ref_forward(x_nchw, params):
    x = jnp.transpose(x_nchw, (0, 2, 3, 1)).astype(jnp.float32)
    for (w, b, g, bt) in params:
        w_hwio = jnp.transpose(w, (2, 3, 1, 0)).astype(jnp.float32)
        y = jax.lax.conv_general_dilated(
            x, w_hwio, (1, 1), "SAME",
            dimension_numbers=("NHWC", "HWIO", "NHWC"),
            precision=jax.lax.Precision.HIGHEST) + b      # bias kept here
        mean = jnp.mean(y, axis=(0, 1, 2), keepdims=True)
        var = jnp.mean((y - mean) ** 2, axis=(0, 1, 2), keepdims=True)
        y = (y - mean) * jax.lax.rsqrt(var + EPS) * g + bt
        x = jnp.maximum(y, 0.0)
    return jnp.transpose(x, (0, 3, 1, 2))


# --------------------------------- Main ---------------------------------------

if __name__ == "__main__":
    in_channels, out_channels = 4, 8
    N, H, W = 2, 16, 16

    key = jax.random.PRNGKey(0)
    k_x, k_w1, k_b1, k_w2, k_b2 = jax.random.split(key, 5)

    x = jax.random.normal(k_x, (N, in_channels, H, W), dtype=jnp.float32)

    # Deterministic synthetic parameters (shapes from nn.Conv2d / nn.BatchNorm2d).
    w1 = 0.1 * jax.random.normal(k_w1, (out_channels, in_channels, 3, 3), jnp.float32)
    b1 = 0.1 * jax.random.normal(k_b1, (out_channels,), jnp.float32)
    g1 = 1.0 + 0.1 * jnp.arange(out_channels, dtype=jnp.float32)
    bt1 = 0.01 * jnp.arange(out_channels, dtype=jnp.float32)

    w2 = 0.1 * jax.random.normal(k_w2, (out_channels, out_channels, 3, 3), jnp.float32)
    b2 = 0.1 * jax.random.normal(k_b2, (out_channels,), jnp.float32)
    g2 = 1.0 - 0.05 * jnp.arange(out_channels, dtype=jnp.float32)
    bt2 = -0.02 * jnp.arange(out_channels, dtype=jnp.float32)

    params = [(w1, b1, g1, bt1), (w2, b2, g2, bt2)]

    fwd = jax.jit(conv_block_forward)
    out = jax.block_until_ready(fwd(x, params))
    ref = jax.block_until_ready(ref_forward(x, params))

    np.testing.assert_allclose(np.asarray(out), np.asarray(ref), rtol=2e-3, atol=2e-3)
    assert out.shape == (N, out_channels, H, W)
    print("KERNEL_OK")
</pallas_src>

<mosaic_0001>
module attributes {stable_mosaic.version = 11 : i64} {
  func.func @_conv_block_kernel(%arg0: i32, %arg1: memref<2x18x64xf32, #tpu.memory_space<vmem>>, %arg2: memref<3x64x128xf32, #tpu.memory_space<vmem>>, %arg3: memref<1x128xf32, #tpu.memory_space<vmem>>, %arg4: memref<1x128xf32, #tpu.memory_space<vmem>>, %arg5: memref<3x128x128xf32, #tpu.memory_space<vmem>>, %arg6: memref<1x128xf32, #tpu.memory_space<vmem>>, %arg7: memref<1x128xf32, #tpu.memory_space<vmem>>, %arg8: memref<128x128xf32, #tpu.memory_space<vmem>>, %arg9: memref<2x16x128xf32, #tpu.memory_space<vmem>>, %arg10: memref<2x18x128xf32, #tpu.memory_space<vmem>>) attributes {dimension_semantics = [#tpu.dimension_semantics<arbitrary>], iteration_bounds = array<i64: 1>, scalar_prefetch = 0 : i64, scratch_operands = 1 : i64, tpu.core_type = #tpu.core_type<tc>, window_params = [{pipeline_mode = #tpu.pipeline_mode<synchronous>, transform_indices = @transform_0, window_bounds = array<i64: 2, 18, 64>}, {pipeline_mode = #tpu.pipeline_mode<synchronous>, transform_indices = @transform_1, window_bounds = array<i64: 3, 64, 128>}, {pipeline_mode = #tpu.pipeline_mode<synchronous>, transform_indices = @transform_2, window_bounds = array<i64: 1, 128>}, {pipeline_mode = #tpu.pipeline_mode<synchronous>, transform_indices = @transform_3, window_bounds = array<i64: 1, 128>}, {pipeline_mode = #tpu.pipeline_mode<synchronous>, transform_indices = @transform_4, window_bounds = array<i64: 3, 128, 128>}, {pipeline_mode = #tpu.pipeline_mode<synchronous>, transform_indices = @transform_5, window_bounds = array<i64: 1, 128>}, {pipeline_mode = #tpu.pipeline_mode<synchronous>, transform_indices = @transform_6, window_bounds = array<i64: 1, 128>}, {pipeline_mode = #tpu.pipeline_mode<synchronous>, transform_indices = @transform_7, window_bounds = array<i64: 128, 128>}, {pipeline_mode = #tpu.pipeline_mode<synchronous>, transform_indices = @transform_8, window_bounds = array<i64: 2, 16, 128>}]} {
    %cst = arith.constant 0.000000e+00 : f32
    %0 = vector.broadcast %cst : f32 to vector<32x128xf32>
    %c0 = arith.constant 0 : index
    %c0_0 = arith.constant 0 : index
    %c0_1 = arith.constant 0 : index
    %1 = vector.load %arg1[%c0, %c0_0, %c0_1] : memref<2x18x64xf32, #tpu.memory_space<vmem>>, vector<2x16x64xf32>
    %2 = vector.shape_cast %1 : vector<2x16x64xf32> to vector<32x64xf32>
    %c0_2 = arith.constant 0 : index
    %c0_3 = arith.constant 0 : index
    %c0_4 = arith.constant 0 : index
    %3 = vector.load %arg2[%c0_2, %c0_3, %c0_4] : memref<3x64x128xf32, #tpu.memory_space<vmem>>, vector<1x64x128xf32>
    %4 = vector.shape_cast %3 : vector<1x64x128xf32> to vector<64x128xf32>
    %cst_5 = arith.constant dense<0.000000e+00> : vector<32x128xf32>
    %5 = tpu.matmul %2, %4, %cst_5 {dimension_numbers = #tpu.dot_dimension_numbers<[1], [0], [0], [1], [0, 0, 1, 1], [], []>} : vector<32x64xf32>, vector<64x128xf32>, vector<32x128xf32> -> vector<32x128xf32>
    %6 = arith.addf %0, %5 : vector<32x128xf32>
    %c0_6 = arith.constant 0 : index
    %c1 = arith.constant 1 : index
    %c0_7 = arith.constant 0 : index
    %7 = vector.load %arg1[%c0_6, %c1, %c0_7] : memref<2x18x64xf32, #tpu.memory_space<vmem>>, vector<2x16x64xf32>
    %8 = vector.shape_cast %7 : vector<2x16x64xf32> to vector<32x64xf32>
    %c1_8 = arith.constant 1 : index
    %c0_9 = arith.constant 0 : index
    %c0_10 = arith.constant 0 : index
    %9 = vector.load %arg2[%c1_8, %c0_9, %c0_10] : memref<3x64x128xf32, #tpu.memory_space<vmem>>, vector<1x64x128xf32>
    %10 = vector.shape_cast %9 : vector<1x64x128xf32> to vector<64x128xf32>
    %cst_11 = arith.constant dense<0.000000e+00> : vector<32x128xf32>
    %11 = tpu.matmul %8, %10, %cst_11 {dimension_numbers = #tpu.dot_dimension_numbers<[1], [0], [0], [1], [0, 0, 1, 1], [], []>} : vector<32x64xf32>, vector<64x128xf32>, vector<32x128xf32> -> vector<32x128xf32>
    %12 = arith.addf %6, %11 : vector<32x128xf32>
    %c0_12 = arith.constant 0 : index
    %c2 = arith.constant 2 : index
    %c0_13 = arith.constant 0 : index
    %13 = vector.load %arg1[%c0_12, %c2, %c0_13] : memref<2x18x64xf32, #tpu.memory_space<vmem>>, vector<2x16x64xf32>
    %14 = vector.shape_cast %13 : vector<2x16x64xf32> to vector<32x64xf32>
    %c2_14 = arith.constant 2 : index
    %c0_15 = arith.constant 0 : index
    %c0_16 = arith.constant 0 : index
    %15 = vector.load %arg2[%c2_14, %c0_15, %c0_16] : memref<3x64x128xf32, #tpu.memory_space<vmem>>, vector<1x64x128xf32>
    %16 = vector.shape_cast %15 : vector<1x64x128xf32> to vector<64x128xf32>
    %cst_17 = arith.constant dense<0.000000e+00> : vector<32x128xf32>
    %17 = tpu.matmul %14, %16, %cst_17 {dimension_numbers = #tpu.dot_dimension_numbers<[1], [0], [0], [1], [0, 0, 1, 1], [], []>} : vector<32x64xf32>, vector<64x128xf32>, vector<32x128xf32> -> vector<32x128xf32>
    %18 = arith.addf %12, %17 : vector<32x128xf32>
    %c0_18 = arith.constant 0 : index
    %c0_19 = arith.constant 0 : index
    %19 = vector.load %arg3[%c0_18, %c0_19] : memref<1x128xf32, #tpu.memory_space<vmem>>, vector<1x128xf32>
    %c0_20 = arith.constant 0 : index
    %c0_21 = arith.constant 0 : index
    %20 = vector.load %arg4[%c0_20, %c0_21] : memref<1x128xf32, #tpu.memory_space<vmem>>, vector<1x128xf32>
    %c0_22 = arith.constant 0 : index
    %c0_23 = arith.constant 0 : index
    %21 = vector.load %arg8[%c0_22, %c0_23] : memref<128x128xf32, #tpu.memory_space<vmem>>, vector<128x128xf32>
    %cst_24 = arith.constant dense<0.000000e+00> : vector<128xf32>
    %22 = vector.multi_reduction <add>, %18, %cst_24 [0] : vector<32x128xf32> to vector<128xf32>
    %23 = vector.shape_cast %22 : vector<128xf32> to vector<1x128xf32>
    %cst_25 = arith.constant dense<0.000000e+00> : vector<1x128xf32>
    %24 = tpu.matmul %23, %21, %cst_25 {dimension_numbers = #tpu.dot_dimension_numbers<[1], [0], [0], [1], [0, 0, 1, 1], [], []>} : vector<1x128xf32>, vector<128x128xf32>, vector<1x128xf32> -> vector<1x128xf32>
    %cst_26 = arith.constant 0.001953125 : f32
    %25 = vector.broadcast %cst_26 : f32 to vector<1x128xf32>
    %26 = arith.mulf %24, %25 : vector<1x128xf32>
    %27 = vector.broadcast %26 : vector<1x128xf32> to vector<32x128xf32>
    %28 = arith.subf %18, %27 : vector<32x128xf32>
    %29 = arith.mulf %28, %28 : vector<32x128xf32>
    %cst_27 = arith.constant dense<0.000000e+00> : vector<128xf32>
    %30 = vector.multi_reduction <add>, %29, %cst_27 [0] : vector<32x128xf32> to vector<128xf32>
    %31 = vector.shape_cast %30 : vector<128xf32> to vector<1x128xf32>
    %cst_28 = arith.constant dense<0.000000e+00> : vector<1x128xf32>
    %32 = tpu.matmul %31, %21, %cst_28 {dimension_numbers = #tpu.dot_dimension_numbers<[1], [0], [0], [1], [0, 0, 1, 1], [], []>} : vector<1x128xf32>, vector<128x128xf32>, vector<1x128xf32> -> vector<1x128xf32>
    %cst_29 = arith.constant 0.001953125 : f32
    %33 = vector.broadcast %cst_29 : f32 to vector<1x128xf32>
    %34 = arith.mulf %32, %33 : vector<1x128xf32>
    %cst_30 = arith.constant 9.99999974E-6 : f32
    %35 = vector.broadcast %cst_30 : f32 to vector<1x128xf32>
    %36 = arith.addf %34, %35 : vector<1x128xf32>
    %37 = math.rsqrt %36 : vector<1x128xf32>
    %38 = vector.broadcast %37 : vector<1x128xf32> to vector<32x128xf32>
    %39 = arith.mulf %28, %38 : vector<32x128xf32>
    %40 = vector.broadcast %19 : vector<1x128xf32> to vector<32x128xf32>
    %41 = arith.mulf %39, %40 : vector<32x128xf32>
    %42 = vector.broadcast %20 : vector<1x128xf32> to vector<32x128xf32>
    %43 = arith.addf %41, %42 : vector<32x128xf32>
    %cst_31 = arith.constant 0.000000e+00 : f32
    %44 = vector.broadcast %cst_31 : f32 to vector<32x128xf32>
    %45 = arith.maximumf %43, %44 : vector<32x128xf32>
    %cst_32 = arith.constant 0.000000e+00 : f32
    %46 = vector.broadcast %cst_32 : f32 to vector<2x1x128xf32>
    %c0_33 = arith.constant 0 : index
    %c0_34 = arith.constant 0 : index
    %c0_35 = arith.constant 0 : index
    %47 = vector.load %arg10[%c0_33, %c0_34, %c0_35] : memref<2x18x128xf32, #tpu.memory_space<vmem>>, vector<2x1x128xf32>
    tpu.vector_store %arg10[%c0_33, %c0_34, %c0_35], %46 {strides = array<i32>} : memref<2x18x128xf32, #tpu.memory_space<vmem>>, vector<2x1x128xf32>,
    %cst_36 = arith.constant 0.000000e+00 : f32
    %48 = vector.broadcast %cst_36 : f32 to vector<2x1x128xf32>
    %c0_37 = arith.constant 0 : index
    %c17 = arith.constant 17 : index
    %c0_38 = arith.constant 0 : index
    %49 = vector.load %arg10[%c0_37, %c17, %c0_38] : memref<2x18x128xf32, #tpu.memory_space<vmem>>, vector<2x1x128xf32>
    tpu.vector_store %arg10[%c0_37, %c17, %c0_38], %48 {strides = array<i32>} : memref<2x18x128xf32, #tpu.memory_space<vmem>>, vector<2x1x128xf32>,
    %50 = vector.shape_cast %45 : vector<32x128xf32> to vector<2x16x128xf32>
    %c0_39 = arith.constant 0 : index
    %c1_40 = arith.constant 1 : index
    %c0_41 = arith.constant 0 : index
    %51 = vector.load %arg10[%c0_39, %c1_40, %c0_41] : memref<2x18x128xf32, #tpu.memory_space<vmem>>, vector<2x16x128xf32>
    tpu.vector_store %arg10[%c0_39, %c1_40, %c0_41], %50 {strides = array<i32>} : memref<2x18x128xf32, #tpu.memory_space<vmem>>, vector<2x16x128xf32>,
    %cst_42 = arith.constant 0.000000e+00 : f32
    %52 = vector.broadcast %cst_42 : f32 to vector<32x128xf32>
    %c0_43 = arith.constant 0 : index
    %c0_44 = arith.constant 0 : index
    %c0_45 = arith.constant 0 : index
    %53 = vector.load %arg10[%c0_43, %c0_44, %c0_45] : memref<2x18x128xf32, #tpu.memory_space<vmem>>, vector<2x16x128xf32>
    %54 = vector.shape_cast %53 : vector<2x16x128xf32> to vector<32x128xf32>
    %c0_46 = arith.constant 0 : index
    %c0_47 = arith.constant 0 : index
    %c0_48 = arith.constant 0 : index
    %55 = vector.load %arg5[%c0_46, %c0_47, %c0_48] : memref<3x128x128xf32, #tpu.memory_space<vmem>>, vector<1x128x128xf32>
    %56 = vector.shape_cast %55 : vector<1x128x128xf32> to vector<128x128xf32>
    %cst_49 = arith.constant dense<0.000000e+00> : vector<32x128xf32>
    %57 = tpu.matmul %54, %56, %cst_49 {dimension_numbers = #tpu.dot_dimension_numbers<[1], [0], [0], [1], [0, 0, 1, 1], [], []>} : vector<32x128xf32>, vector<128x128xf32>, vector<32x128xf32> -> vector<32x128xf32>
    %58 = arith.addf %52, %57 : vector<32x128xf32>
    %c0_50 = arith.constant 0 : index
    %c1_51 = arith.constant 1 : index
    %c0_52 = arith.constant 0 : index
    %59 = vector.load %arg10[%c0_50, %c1_51, %c0_52] : memref<2x18x128xf32, #tpu.memory_space<vmem>>, vector<2x16x128xf32>
    %60 = vector.shape_cast %59 : vector<2x16x128xf32> to vector<32x128xf32>
    %c1_53 = arith.constant 1 : index
    %c0_54 = arith.constant 0 : index
    %c0_55 = arith.constant 0 : index
    %61 = vector.load %arg5[%c1_53, %c0_54, %c0_55] : memref<3x128x128xf32, #tpu.memory_space<vmem>>, vector<1x128x128xf32>
    %62 = vector.shape_cast %61 : vector<1x128x128xf32> to vector<128x128xf32>
    %cst_56 = arith.constant dense<0.000000e+00> : vector<32x128xf32>
    %63 = tpu.matmul %60, %62, %cst_56 {dimension_numbers = #tpu.dot_dimension_numbers<[1], [0], [0], [1], [0, 0, 1, 1], [], []>} : vector<32x128xf32>, vector<128x128xf32>, vector<32x128xf32> -> vector<32x128xf32>
    %64 = arith.addf %58, %63 : vector<32x128xf32>
    %c0_57 = arith.constant 0 : index
    %c2_58 = arith.constant 2 : index
    %c0_59 = arith.constant 0 : index
    %65 = vector.load %arg10[%c0_57, %c2_58, %c0_59] : memref<2x18x128xf32, #tpu.memory_space<vmem>>, vector<2x16x128xf32>
    %66 = vector.shape_cast %65 : vector<2x16x128xf32> to vector<32x128xf32>
    %c2_60 = arith.constant 2 : index
    %c0_61 = arith.constant 0 : index
    %c0_62 = arith.constant 0 : index
    %67 = vector.load %arg5[%c2_60, %c0_61, %c0_62] : memref<3x128x128xf32, #tpu.memory_space<vmem>>, vector<1x128x128xf32>
    %68 = vector.shape_cast %67 : vector<1x128x128xf32> to vector<128x128xf32>
    %cst_63 = arith.constant dense<0.000000e+00> : vector<32x128xf32>
    %69 = tpu.matmul %66, %68, %cst_63 {dimension_numbers = #tpu.dot_dimension_numbers<[1], [0], [0], [1], [0, 0, 1, 1], [], []>} : vector<32x128xf32>, vector<128x128xf32>, vector<32x128xf32> -> vector<32x128xf32>
    %70 = arith.addf %64, %69 : vector<32x128xf32>
    %c0_64 = arith.constant 0 : index
    %c0_65 = arith.constant 0 : index
    %71 = vector.load %arg6[%c0_64, %c0_65] : memref<1x128xf32, #tpu.memory_space<vmem>>, vector<1x128xf32>
    %c0_66 = arith.constant 0 : index
    %c0_67 = arith.constant 0 : index
    %72 = vector.load %arg7[%c0_66, %c0_67] : memref<1x128xf32, #tpu.memory_space<vmem>>, vector<1x128xf32>
    %c0_68 = arith.constant 0 : index
    %c0_69 = arith.constant 0 : index
    %73 = vector.load %arg8[%c0_68, %c0_69] : memref<128x128xf32, #tpu.memory_space<vmem>>, vector<128x128xf32>
    %cst_70 = arith.constant dense<0.000000e+00> : vector<128xf32>
    %74 = vector.multi_reduction <add>, %70, %cst_70 [0] : vector<32x128xf32> to vector<128xf32>
    %75 = vector.shape_cast %74 : vector<128xf32> to vector<1x128xf32>
    %cst_71 = arith.constant dense<0.000000e+00> : vector<1x128xf32>
    %76 = tpu.matmul %75, %73, %cst_71 {dimension_numbers = #tpu.dot_dimension_numbers<[1], [0], [0], [1], [0, 0, 1, 1], [], []>} : vector<1x128xf32>, vector<128x128xf32>, vector<1x128xf32> -> vector<1x128xf32>
    %cst_72 = arith.constant 0.001953125 : f32
    %77 = vector.broadcast %cst_72 : f32 to vector<1x128xf32>
    %78 = arith.mulf %76, %77 : vector<1x128xf32>
    %79 = vector.broadcast %78 : vector<1x128xf32> to vector<32x128xf32>
    %80 = arith.subf %70, %79 : vector<32x128xf32>
    %81 = arith.mulf %80, %80 : vector<32x128xf32>
    %cst_73 = arith.constant dense<0.000000e+00> : vector<128xf32>
    %82 = vector.multi_reduction <add>, %81, %cst_73 [0] : vector<32x128xf32> to vector<128xf32>
    %83 = vector.shape_cast %82 : vector<128xf32> to vector<1x128xf32>
    %cst_74 = arith.constant dense<0.000000e+00> : vector<1x128xf32>
    %84 = tpu.matmul %83, %73, %cst_74 {dimension_numbers = #tpu.dot_dimension_numbers<[1], [0], [0], [1], [0, 0, 1, 1], [], []>} : vector<1x128xf32>, vector<128x128xf32>, vector<1x128xf32> -> vector<1x128xf32>
    %cst_75 = arith.constant 0.001953125 : f32
    %85 = vector.broadcast %cst_75 : f32 to vector<1x128xf32>
    %86 = arith.mulf %84, %85 : vector<1x128xf32>
    %cst_76 = arith.constant 9.99999974E-6 : f32
    %87 = vector.broadcast %cst_76 : f32 to vector<1x128xf32>
    %88 = arith.addf %86, %87 : vector<1x128xf32>
    %89 = math.rsqrt %88 : vector<1x128xf32>
    %90 = vector.broadcast %89 : vector<1x128xf32> to vector<32x128xf32>
    %91 = arith.mulf %80, %90 : vector<32x128xf32>
    %92 = vector.broadcast %71 : vector<1x128xf32> to vector<32x128xf32>
    %93 = arith.mulf %91, %92 : vector<32x128xf32>
    %94 = vector.broadcast %72 : vector<1x128xf32> to vector<32x128xf32>
    %95 = arith.addf %93, %94 : vector<32x128xf32>
    %cst_77 = arith.constant 0.000000e+00 : f32
    %96 = vector.broadcast %cst_77 : f32 to vector<32x128xf32>
    %97 = arith.maximumf %95, %96 : vector<32x128xf32>
    %98 = vector.shape_cast %97 : vector<32x128xf32> to vector<2x16x128xf32>
    %c0_78 = arith.constant 0 : index
    %c0_79 = arith.constant 0 : index
    %c0_80 = arith.constant 0 : index
    %99 = vector.load %arg9[%c0_78, %c0_79, %c0_80] : memref<2x16x128xf32, #tpu.memory_space<vmem>>, vector<2x16x128xf32>
    tpu.vector_store %arg9[%c0_78, %c0_79, %c0_80], %98 {strides = array<i32>} : memref<2x16x128xf32, #tpu.memory_space<vmem>>, vector<2x16x128xf32>,
    return
  }
  func.func @transform_0(%arg0: i32) -> (i32, i32, i32) {
    %c0_i32 = arith.constant 0 : i32
    %c0_i32_0 = arith.constant 0 : i32
    %c0_i32_1 = arith.constant 0 : i32
    %c0_i32_2 = arith.constant 0 : i32
    return %c0_i32, %c0_i32_0, %c0_i32_1 : i32, i32, i32
  }
  func.func @transform_1(%arg0: i32) -> (i32, i32, i32) {
    %c0_i32 = arith.constant 0 : i32
    %c0_i32_0 = arith.constant 0 : i32
    %c0_i32_1 = arith.constant 0 : i32
    %c0_i32_2 = arith.constant 0 : i32
    return %c0_i32, %c0_i32_0, %c0_i32_1 : i32, i32, i32
  }
  func.func @transform_2(%arg0: i32) -> (i32, i32) {
    %c0_i32 = arith.constant 0 : i32
    %c0_i32_0 = arith.constant 0 : i32
    %c0_i32_1 = arith.constant 0 : i32
    return %c0_i32, %c0_i32_0 : i32, i32
  }
  func.func @transform_3(%arg0: i32) -> (i32, i32) {
    %c0_i32 = arith.constant 0 : i32
    %c0_i32_0 = arith.constant 0 : i32
    %c0_i32_1 = arith.constant 0 : i32
    return %c0_i32, %c0_i32_0 : i32, i32
  }
  func.func @transform_4(%arg0: i32) -> (i32, i32, i32) {
    %c0_i32 = arith.constant 0 : i32
    %c0_i32_0 = arith.constant 0 : i32
    %c0_i32_1 = arith.constant 0 : i32
    %c0_i32_2 = arith.constant 0 : i32
    return %c0_i32, %c0_i32_0, %c0_i32_1 : i32, i32, i32
  }
  func.func @transform_5(%arg0: i32) -> (i32, i32) {
    %c0_i32 = arith.constant 0 : i32
    %c0_i32_0 = arith.constant 0 : i32
    %c0_i32_1 = arith.constant 0 : i32
    return %c0_i32, %c0_i32_0 : i32, i32
  }
  func.func @transform_6(%arg0: i32) -> (i32, i32) {
    %c0_i32 = arith.constant 0 : i32
    %c0_i32_0 = arith.constant 0 : i32
    %c0_i32_1 = arith.constant 0 : i32
    return %c0_i32, %c0_i32_0 : i32, i32
  }
  func.func @transform_7(%arg0: i32) -> (i32, i32) {
    %c0_i32 = arith.constant 0 : i32
    %c0_i32_0 = arith.constant 0 : i32
    %c0_i32_1 = arith.constant 0 : i32
    return %c0_i32, %c0_i32_0 : i32, i32
  }
  func.func @transform_8(%arg0: i32) -> (i32, i32, i32) {
    %c0_i32 = arith.constant 0 : i32
    %c0_i32_0 = arith.constant 0 : i32
    %c0_i32_1 = arith.constant 0 : i32
    %c0_i32_2 = arith.constant 0 : i32
    return %c0_i32, %c0_i32_0, %c0_i32_1 : i32, i32, i32
  }
}

</mosaic_0001>

<bundles_post_ra>
// kernel: conv_block_forward.1
= control target key start
LH: loop header
LB: loop body
LE: loop exit
PB: predicated region body
PF: predicated region fallthrough
CT: control target
= control target key end

     0   :  { %vm54_vm0 = vcmask 523264   ;;  %v1959_v44 = vmov 0.0|0.0   ;;  %vm1960_vm1 = vmmov 0   ;;  %s2461_s1 = inlined_call_operand.vmem [shape: f32[3,64,128], index: 1, kind: input, shape index: {}]   ;;  %s2462_s0 = inlined_call_operand.vmem [shape: f32[2,18,64], index: 0, kind: input, shape index: {}]   ;;  %s2463_s7 = inlined_call_operand.vmem [shape: f32[128,128], index: 7, kind: input, shape index: {}]   ;;  %s2464_s4 = inlined_call_operand.vmem [shape: f32[3,128,128], index: 4, kind: input, shape index: {}]   ;;  %s2465_s2 = inlined_call_operand.vmem [shape: f32[1,128], index: 2, kind: input, shape index: {}]   ;;  %s2466_s3 = inlined_call_operand.vmem [shape: f32[1,128], index: 3, kind: input, shape index: {}]   ;;  %s2467_s5 = inlined_call_operand.vmem [shape: f32[1,128], index: 5, kind: input, shape index: {}]   ;;  %s2468_s6 = inlined_call_operand.vmem [shape: f32[1,128], index: 6, kind: input, shape index: {}]   ;;  %s2469_s8 = inlined_call_operand.vmem [shape: f32[2,16,128], index: 8, kind: output, shape index: {}]  }
   0x1   :  { %v33_v0 = vld [vmem:[%s2461_s1] sm:$0xff]  ;;  %v34_v1 = vld [vmem:[%s2461_s1 + $0x8] sm:$0xff]  ;;  %v35_v2 = vld [vmem:[%s2461_s1 + $0x10] sm:$0xff] }
   0x2   :  { %v1712_v3 = vpack.c.bf16 %v34_v1, %v33_v0  ;;  %v36_v4 = vld [vmem:[%s2461_s1 + $0x18] sm:$0xff]  ;;  %v37_v6 = vld [vmem:[%s2461_s1 + $0x20] sm:$0xff]  ;;  %v38_v7 = vld [vmem:[%s2461_s1 + $0x28] sm:$0xff] }
   0x3   :  { %v1716_v5 = vpack.c.bf16 %v36_v4, %v35_v2  ;;  %v1148_v8 = vld [vmem:[%s2461_s1 + $0x40] sm:$0xff]  ;;  %v1149_v9 = vld [vmem:[%s2461_s1 + $0x48] sm:$0xff]  ;;  %v1150_v12 = vld [vmem:[%s2461_s1 + $0x50] sm:$0xff]  ;;  %v1720_v13 = vpack.c.bf16 %v38_v7, %v37_v6 }
   0x4   :  { %1713 = vmatprep.subr.bf16.mxu0 %v1712_v3  ;;  %v29_v10 = vld [vmem:[%s2462_s0] sm:$0xff]  ;;  %v1696_v11 = vpack.c.bf16 %v1149_v9, %v1148_v8  ;;  %v39_v14 = vld [vmem:[%s2461_s1 + $0x30] sm:$0xff]  ;;  %v1151_v15 = vld [vmem:[%s2461_s1 + $0x58] sm:$0xff]  ;;  %v1961_v9 = vmov 0.0  }
   0x5   :  { %1715 = vmatpush3.bf16.msra.mxu0 %v1712_v3  ;;  %1414 = vmatprep.mubr.msk.f32.mxu0 %vm54_vm0, %v29_v10  ;;  %v40_v16 = vld [vmem:[%s2461_s1 + $0x38] sm:$0xff]  ;;  %v1700_v17 = vpack.c.bf16 %v1151_v15, %v1150_v12  ;;  %v1152_v18 = vld [vmem:[%s2461_s1 + $0x60] sm:$0xff]  ;;  %v1153_v19 = vld [vmem:[%s2461_s1 + $0x68] sm:$0xff]  ;;  %587 = vst [vmem:[#allocation2] sm:$0x1] %v1961_v9 }
   0x6   :  { %1717 = vmatprep.subr.bf16.mxu0 %v1716_v5  ;;  %1697 = vmatprep.subr.bf16.mxu1 %v1696_v11  ;;  %v1704_v20 = vpack.c.bf16 %v1153_v19, %v1152_v18  ;;  %v1724_v21 = vpack.c.bf16 %v40_v16, %v39_v14  ;;  %v1154_v22 = vld [vmem:[%s2461_s1 + $0x70] sm:$0xff]  ;;  %v1155_v23 = vld [vmem:[%s2461_s1 + $0x78] sm:$0xff]  ;;  %v41_v24 = vld [vmem:[%s2462_s0 + $0x1] sm:$0xff]  ;;  %588 = vst [vmem:[#allocation2 + $0x18] sm:$0x1] %v1961_v9 }
   0x7   :  { %1699 = vmatpush3.bf16.msra.mxu1 %v1696_v11  ;;  %v1164_v25 = vld [vmem:[%s2461_s1 + $0x80] sm:$0xff]  ;;  %v1165_v26 = vld [vmem:[%s2461_s1 + $0x88] sm:$0xff]  ;;  %1392 = vmatprep.mubr.msk.f32.mxu1 %vm54_vm0, %v41_v24  ;;  %v1708_v27 = vpack.c.bf16 %v1155_v23, %v1154_v22  ;;  %v1166_v29 = vld [vmem:[%s2461_s1 + $0x90] sm:$0xff]  ;;  %589 = vst [vmem:[#allocation2 + $0x11] sm:$0x1] %v1961_v9 }
   0x8   :  { %1701 = vmatprep.subr.bf16.mxu1 %v1700_v17  ;;  %v1728_v28 = vpack.c.bf16 %v1165_v26, %v1164_v25  ;;  %v1167_v30 = vld [vmem:[%s2461_s1 + $0x98] sm:$0xff]  ;;  %v30_v31 = vld [vmem:[%s2462_s0 + $0x8] sm:$0xff]  ;;  %v1168_v33 = vld [vmem:[%s2461_s1 + $0xa0] sm:$0xff]  ;;  %590 = vst [vmem:[#allocation2 + $0x29] sm:$0x1] %v1961_v9 }
   0x9   :  { %1719 = vmatpush3.bf16.msra.mxu0 %v1716_v5  ;;  %v1732_v32 = vpack.c.bf16 %v1167_v30, %v1166_v29  ;;  %v31_v34 = vld [vmem:[%s2462_s0 + $0x18] sm:$0xff]  ;;  %v1169_v35 = vld [vmem:[%s2461_s1 + $0xa8] sm:$0xff]  ;;  %v365_v36 = vld [vmem:[%s2463_s7] sm:$0xff] }
   0xa   :  { %1721 = vmatprep.subr.bf16.mxu0 %v1720_v13  ;;  %v366_v37 = vld [vmem:[%s2463_s7 + $0x8] sm:$0xff]  ;;  %v32_v39 = vld [vmem:[%s2462_s0 + $0x20] sm:$0xff]  ;;  %v1736_v41 = vpack.c.bf16 %v1169_v35, %v1168_v33  ;;  %v1170_v42 = vld [vmem:[%s2461_s1 + $0xb0] sm:$0xff] }
   0xb   :  { %1703 = vmatpush3.bf16.msra.mxu1 %v1700_v17  ;;  %v42_v38 = vld [vmem:[%s2462_s0 + $0x9] sm:$0xff]  ;;  %v43_v40 = vld [vmem:[%s2462_s0 + $0x19] sm:$0xff]  ;;  %v2111_v45 = vpack.c.bf16 %v366_v37, %v365_v36  ;;  %v44_v49 = vld [vmem:[%s2462_s0 + $0x21] sm:$0xff] }
   0xc   :  { %1705 = vmatprep.subr.bf16.mxu1 %v1704_v20  ;;  %v249_v43 = vld [vmem:[%s2462_s0 + $0x2] sm:$0xff]  ;;  %v1171_v46 = vld [vmem:[%s2461_s1 + $0xb8] sm:$0xff]  ;;  %v367_v47 = vld [vmem:[%s2463_s7 + $0x10] sm:$0xff] }
   0xd   :  { %1723 = vmatpush3.bf16.msra.mxu0 %v1720_v13  ;;  %v368_v48 = vld [vmem:[%s2463_s7 + $0x18] sm:$0xff]  ;;  %v1740_v50 = vpack.c.bf16 %v1171_v46, %v1170_v42  ;;  %v250_v52 = vld [vmem:[%s2462_s0 + $0xa] sm:$0xff]  ;;  %v252_v54 = vld [vmem:[%s2462_s0 + $0x22] sm:$0xff] }
   0xe   :  { %1725 = vmatprep.subr.bf16.mxu0 %v1724_v21  ;;  %v2130_v51 = vpack.c.bf16 %v368_v48, %v367_v47  ;;  %v251_v53 = vld [vmem:[%s2462_s0 + $0x1a] sm:$0xff]  ;;  %v370_v56 = vld [vmem:[%s2463_s7 + $0x28] sm:$0xff]  ;;  %v371_v58 = vld [vmem:[%s2463_s7 + $0x30] sm:$0xff] }
   0xf   :  { %1707 = vmatpush3.bf16.msra.mxu1 %v1704_v20  ;;  %v369_v55 = vld [vmem:[%s2463_s7 + $0x20] sm:$0xff]  ;;  %v372_v59 = vld [vmem:[%s2463_s7 + $0x38] sm:$0xff]  ;;  %v374_v62 = vld [vmem:[%s2463_s7 + $0x48] sm:$0xff] }
  0x10   :  { %1709 = vmatprep.subr.bf16.mxu1 %v1708_v27  ;;  %v2154_v57 = vpack.c.bf16 %v370_v56, %v369_v55  ;;  %v2164_v60 = vpack.c.bf16 %v372_v59, %v371_v58  ;;  %v373_v61 = vld [vmem:[%s2463_s7 + $0x40] sm:$0xff]  ;;  %v375_v0 = vld [vmem:[%s2463_s7 + $0x50] sm:$0xff]  ;;  %v376_v1 = vld [vmem:[%s2463_s7 + $0x58] sm:$0xff] }
  0x11   :  { %1727 = vmatpush3.bf16.msra.mxu0 %v1724_v21  ;;  %v2174_v63 = vpack.c.bf16 %v374_v62, %v373_v61  ;;  %v2184_v2 = vpack.c.bf16 %v376_v1, %v375_v0  ;;  %v377_v3 = vld [vmem:[%s2463_s7 + $0x60] sm:$0xff]  ;;  %v378_v4 = vld [vmem:[%s2463_s7 + $0x68] sm:$0xff]  ;;  %v379_v6 = vld [vmem:[%s2463_s7 + $0x70] sm:$0xff] }
  0x12   :  { %1729 = vmatprep.subr.bf16.mxu0 %v1728_v28  ;;  %v2194_v5 = vpack.c.bf16 %v378_v4, %v377_v3  ;;  %v380_v7 = vld [vmem:[%s2463_s7 + $0x78] sm:$0xff]  ;;  %v1178_v59 = vld [vmem:[%s2464_s4 + $0x80] sm:$0xff]  ;;  %v1179_v61 = vld [vmem:[%s2464_s4 + $0x88] sm:$0xff] }
  0x13   :  { %1711 = vmatpush3.bf16.msra.mxu1 %v1708_v27  ;;  %v2204_v8 = vpack.c.bf16 %v380_v7, %v379_v6  ;;  %v1792_v62 = vpack.c.bf16 %v1179_v61, %v1178_v59  ;;  %v1180_v0 = vld [vmem:[%s2464_s4 + $0x90] sm:$0xff]  ;;  %v1181_v1 = vld [vmem:[%s2464_s4 + $0x98] sm:$0xff]  ;;  %v1182_v4 = vld [vmem:[%s2464_s4 + $0xa0] sm:$0xff] }
  0x14   :  { %1415 = vmatmul.mubr.msk.f32.vlgmr.msra.gmra.mrb[0].mxu0 %vm54_vm0, %v30_v31  ;;  %1744 = vmatprep.subr.bf16.mxu1 %v1959_v44  ;;  %v461_v31 = vlaneseq  ;;  %v1796_v3 = vpack.c.bf16 %v1181_v1, %v1180_v0  ;;  %v1183_v6 = vld [vmem:[%s2464_s4 + $0xa8] sm:$0xff]  ;;  %v603_v61 = vld [vmem:[%s2464_s4 + $0x20] sm:$0xff]  ;;  %v605_v1 = vld [vmem:[%s2464_s4 + $0x30] sm:$0xff] }
  0x15   :  { %1731 = vmatpush3.bf16.msra.mxu0 %v1728_v28  ;;  %1417 = vmatprep.mubr.msk.f32.mxu0 %vm54_vm0, %v31_v34  ;;  %v1800_v7 = vpack.c.bf16 %v1183_v6, %v1182_v4 }
  0x16   :  { %1733 = vmatprep.subr.bf16.mxu0 %v1732_v32  ;;  %1393 = vmatmul.mubr.msk.f32.vlgmr.msra.gmra.mrb[0].mxu1 %vm54_vm0, %v42_v38 }
  0x17   :  { %1395 = vmatprep.mubr.msk.f32.mxu1 %vm54_vm0, %v43_v40  ;;  %1746 = vmatpush3.bf16.msra.mxu1 %v2111_v45 }
  0x18   :  { %1418 = vmatmul.mubr.msk.f32.gmra.mrb[2].mxu0 %vm54_vm0, %v32_v39  ;;  %1747 = vmatprep.subr.bf16.mxu1 %v1959_v44 }
  0x19   :  { %1735 = vmatpush3.bf16.msra.mxu0 %v1732_v32  ;;  %1436 = vmatprep.mubr.msk.f32.mxu0 %vm54_vm0, %v249_v43  ;;  %v462_v32 = vshrl.u32 %v461_v31, 7 }
  0x1a   :  { %1737 = vmatprep.subr.bf16.mxu0 %v1736_v41  ;;  %1396 = vmatmul.mubr.msk.f32.gmra.mrb[2].mxu1 %vm54_vm0, %v44_v49 }
  0x1b   :  { %1749 = vmatpush3.bf16.msra.mxu1 %v2130_v51  ;;  %1474 = vmatprep.mubr.msk.f32.mxu1 %vm1960_vm1, %v1961_v9  ;;  %v2232_v33 = vsub.s32 0, %v462_v32 }
  0x1c   :  { %1750 = vmatprep.subr.bf16.mxu1 %v1959_v44 }
  0x1d   :  { %1739 = vmatpush3.bf16.msra.mxu0 %v1736_v41 }
  0x1e   :  { %1741 = vmatprep.subr.bf16.mxu0 %v1740_v50 }
  0x1f   :  { %1752 = vmatpush3.bf16.msra.mxu1 %v2154_v57 }
  0x20   :  { %1753 = vmatprep.subr.bf16.mxu1 %v1959_v44 }
  0x21   :  { %1743 = vmatpush3.bf16.msra.mxu0 %v1740_v50 }
  0x22   :  { %1793 = vmatprep.subr.bf16.mxu0 %v1792_v62 }
  0x23   :  { %1755 = vmatpush3.bf16.msra.mxu1 %v2164_v60 }
  0x24   :  { %1437 = vmatmul.mubr.msk.f32.vlgmr.msra.gmra.mrb[0].mxu0 %vm54_vm0, %v250_v52  ;;  %1756 = vmatprep.subr.bf16.mxu1 %v1959_v44 }
  0x25   :  { %1439 = vmatprep.mubr.msk.f32.mxu0 %vm54_vm0, %v251_v53  ;;  %1795 = vmatpush3.bf16.msra.mxu0 %v1792_v62  ;;  %v604_v62 = vld [vmem:[%s2464_s4 + $0x28] sm:$0xff] }
  0x26   :  { %1797 = vmatprep.subr.bf16.mxu0 %v1796_v3  ;;  %v1832_v0 = vpack.c.bf16 %v604_v62, %v603_v61 }
  0x27   :  { %1758 = vmatpush3.bf16.msra.mxu1 %v2174_v63 }
  0x28   :  { %1440 = vmatmul.mubr.msk.f32.gmra.mrb[2].mxu0 %vm54_vm0, %v252_v54  ;;  %1759 = vmatprep.subr.bf16.mxu1 %v1959_v44 }
  0x29   :  { %1799 = vmatpush3.bf16.msra.mxu0 %v1796_v3  ;;  %v606_v3 = vld [vmem:[%s2464_s4 + $0x38] sm:$0xff] }
  0x2a   :  { %1801 = vmatprep.subr.bf16.mxu0 %v1800_v7  ;;  %v1836_v6 = vpack.c.bf16 %v606_v3, %v605_v1 }
  0x2b   :  { %1761 = vmatpush3.bf16.msra.mxu1 %v2184_v2 }
  0x2c   :  { %1762 = vmatprep.subr.bf16.mxu1 %v1959_v44 }
  0x2d   :  { %1803 = vmatpush3.bf16.msra.mxu0 %v1800_v7  ;;  %v607_v7 = vld [vmem:[%s2464_s4 + $0x40] sm:$0xff] }
  0x2f   :  { %1764 = vmatpush3.bf16.msra.mxu1 %v2194_v5 }
  0x30   :  { %1765 = vmatprep.subr.bf16.mxu1 %v1959_v44 }
  0x33   :  { %1767 = vmatpush3.bf16.msra.mxu1 %v2204_v8 }
  0x34   :  { %1768 = vmatprep.subr.bf16.mxu1 %v1959_v44 }
  0xe9   :  { %v1394_v10 = vpop.f32.mrb[0].mxu1 }
  0xea   :  { %v133_v11 = vpop.f32.mrb[1].mxu1 }
  0xed   :  { %v1397_v12 = vpop.f32.mrb[2].mxu1 }
  0xee   :  { %v143_v13 = vpop.f32.mrb[3].mxu1 }
  0xf7   :  { %v1438_v14 = vpop.f32.mrb[0].mxu0 }
  0xf8   :  { %v1936_v15 = vadd.f32 %v1438_v14, %v1394_v10  ;;  %v340_v16 = vpop.f32.mrb[1].mxu0  ;;  %v1184_v10 = vld [vmem:[%s2464_s4 + $0xb0] sm:$0xff]  ;;  %v1187_v14 = vld [vmem:[%s2464_s4 + $0xc8] sm:$0xff] }
  0xf9   :  { %v1937_v17 = vadd.f32 %v340_v16, %v133_v11  ;;  %v1185_v11 = vld [vmem:[%s2464_s4 + $0xb8] sm:$0xff]  ;;  %v1188_v16 = vld [vmem:[%s2464_s4 + $0xd0] sm:$0xff] }
  0xfb   :  { %v1441_v18 = vpop.f32.mrb[2].mxu0  ;;  %v381_v21 = vadd.f32 %v1937_v17, %v1936_v15 }
  0xfc   :  { %v1938_v19 = vadd.f32 %v1441_v18, %v1397_v12  ;;  %v350_v20 = vpop.f32.mrb[3].mxu0  ;;  %v1804_v12 = vpack.c.bf16 %v1185_v11, %v1184_v10  ;;  %v608_v10 = vld [vmem:[%s2464_s4 + $0x48] sm:$0xff] }
  0xfd   :  { %v1939_v22 = vadd.f32 %v350_v20, %v143_v13  ;;  %v1186_v13 = vld [vmem:[%s2464_s4 + $0xc0] sm:$0xff]  ;;  %v1191_v20 = vld [vmem:[%s2464_s4 + $0xe8] sm:$0xff]  ;;  %v1840_v11 = vpack.c.bf16 %v608_v10, %v607_v7 }
  0xfe   :  { %1805 = vmatprep.subr.bf16.mxu0 %v1804_v12 }
  0xff   :  { %v382_v23 = vadd.f32 %v1939_v22, %v381_v21  ;;  %1807 = vmatpush3.bf16.msra.mxu0 %v1804_v12  ;;  %v609_v12 = vld [vmem:[%s2464_s4 + $0x50] sm:$0xff] }
 0x101   :  { %v383_v24 = vadd.f32 %v1938_v19, %v382_v23  ;;  %v1193_v23 = vld [vmem:[%s2464_s4 + $0xf8] sm:$0xff] }
 0x103   :  { %v384_v25 = vrot.slane %v383_v24, 4 }
 0x105   :  { %v385_v26 = vadd.f32 %v384_v25, %v383_v24  ;;  %v599_v25 = vld [vmem:[%s2464_s4] sm:$0xff] }
 0x107   :  { %v386_v27 = vrot.slane %v385_v26, 2 }
 0x109   :  { %v387_v28 = vadd.f32 %v386_v27, %v385_v26  ;;  %v600_v26 = vld [vmem:[%s2464_s4 + $0x8] sm:$0xff] }
 0x10a   :  { %v1824_v27 = vpack.c.bf16 %v600_v26, %v599_v25  ;;  %v1197_v25 = vld [vmem:[%s2464_s4 + $0x118] sm:$0xff] }
 0x10b   :  { %v388_v29 = vrot.slane %v387_v28, 1 }
 0x10d   :  { %v389_v30 = vadd.f32 %v388_v29, %v387_v28 }
 0x10f   :  { %1475 = vmatmul.mubr.f32.vlgmr.msra.gmra.mrb[4].mxu1 %v389_v30 }
 0x110   :  { %1770 = vmatpush3.bf16.msra.mxu1 %v2111_v45  ;;  %1509 = vmatprep.mubr.msk.f32.mxu1 %vm1960_vm1, %v1961_v9 }
 0x111   :  { %1771 = vmatprep.subr.bf16.mxu1 %v1959_v44 }
 0x114   :  { %1773 = vmatpush3.bf16.msra.mxu1 %v2130_v51 }
 0x115   :  { %1774 = vmatprep.subr.bf16.mxu1 %v1959_v44 }
 0x118   :  { %1776 = vmatpush3.bf16.msra.mxu1 %v2154_v57 }
 0x119   :  { %1777 = vmatprep.subr.bf16.mxu1 %v1959_v44 }
 0x11c   :  { %1779 = vmatpush3.bf16.msra.mxu1 %v2164_v60 }
 0x11d   :  { %1780 = vmatprep.subr.bf16.mxu1 %v1959_v44 }
 0x120   :  { %1782 = vmatpush3.bf16.msra.mxu1 %v2174_v63 }
 0x121   :  { %1783 = vmatprep.subr.bf16.mxu1 %v1959_v44 }
 0x124   :  { %1785 = vmatpush3.bf16.msra.mxu1 %v2184_v2 }
 0x125   :  { %1786 = vmatprep.subr.bf16.mxu1 %v1959_v44 }
 0x128   :  { %1788 = vmatpush3.bf16.msra.mxu1 %v2194_v5 }
 0x129   :  { %1789 = vmatprep.subr.bf16.mxu1 %v1959_v44 }
 0x12c   :  { %1791 = vmatpush3.bf16.msra.mxu1 %v2204_v8 }
 0x12d   :  { %1888 = vmatprep.subr.bf16.mxu1 %v1959_v44 }
 0x1e2   :  { %v456_v34 = vpop.f32.mrb[4].mxu1 }
 0x1e3   :  { %v460_v35 = vmul.f32 0.001953125, %v456_v34  ;;  %v1476_v36 = vpop.f32.mrb[5].mxu1 }
 0x1e5   :  { %v464_v37 = vrot.slane %v460_v35, %v2232_v33  ;;  %v1176_v35 = vld [vmem:[%s2465_s2] ss:$0 sm:$0xff] }
 0x1e7   :  { %v2235_v38 = vsub.f32 %v1937_v17, %v464_v37  ;;  %v2237_v39 = vsub.f32 %v1936_v15, %v464_v37  ;;  %v2239_v40 = vsub.f32 %v1939_v22, %v464_v37  ;;  %v2241_v41 = vsub.f32 %v1938_v19, %v464_v37  ;;  %v1189_v17 = vld [vmem:[%s2464_s4 + $0xd8] sm:$0xff]  ;;  %v1190_v19 = vld [vmem:[%s2464_s4 + $0xe0] sm:$0xff]  ;;  %v1192_v22 = vld [vmem:[%s2464_s4 + $0xf0] sm:$0xff] }
 0x1e8   :  { %v1808_v15 = vpack.c.bf16 %v1187_v14, %v1186_v13  ;;  %v1812_v18 = vpack.c.bf16 %v1189_v17, %v1188_v16  ;;  %v1816_v21 = vpack.c.bf16 %v1191_v20, %v1190_v19  ;;  %v1820_v24 = vpack.c.bf16 %v1193_v23, %v1192_v22  ;;  %v610_v13 = vld [vmem:[%s2464_s4 + $0x58] sm:$0xff]  ;;  %v612_v16 = vld [vmem:[%s2464_s4 + $0x68] sm:$0xff] }
 0x1e9   :  { %v469_v42 = vmul.f32 %v2235_v38, %v2235_v38  ;;  %v470_v43 = vmul.f32 %v2237_v39, %v2237_v39  ;;  %v471_v46 = vmul.f32 %v2239_v40, %v2239_v40  ;;  %v472_v48 = vmul.f32 %v2241_v41, %v2241_v41  ;;  %v614_v19 = vld [vmem:[%s2464_s4 + $0x78] sm:$0xff]  ;;  %v1195_v22 = vld [vmem:[%s2464_s4 + $0x108] sm:$0xff] }
 0x1ea   :  { %1809 = vmatprep.subr.bf16.mxu0 %v1808_v15  ;;  %v1844_v14 = vpack.c.bf16 %v610_v13, %v609_v12 }
 0x1eb   :  { %v473_v47 = vadd.f32 %v470_v43, %v469_v42  ;;  %1811 = vmatpush3.bf16.msra.mxu0 %v1808_v15  ;;  %v611_v15 = vld [vmem:[%s2464_s4 + $0x60] sm:$0xff] }
 0x1ec   :  { %1813 = vmatprep.subr.bf16.mxu0 %v1812_v18  ;;  %v1848_v17 = vpack.c.bf16 %v612_v16, %v611_v15 }
 0x1ed   :  { %v474_v49 = vadd.f32 %v473_v47, %v471_v46  ;;  %v1177_v46 = vld [vmem:[%s2466_s3] ss:$0 sm:$0xff] }
 0x1ef   :  { %v475_v50 = vadd.f32 %v474_v49, %v472_v48  ;;  %1815 = vmatpush3.bf16.msra.mxu0 %v1812_v18  ;;  %v613_v18 = vld [vmem:[%s2464_s4 + $0x70] sm:$0xff] }
 0x1f0   :  { %1817 = vmatprep.subr.bf16.mxu0 %v1816_v21  ;;  %v1852_v20 = vpack.c.bf16 %v614_v19, %v613_v18 }
 0x1f1   :  { %v476_v52 = vrot.slane %v475_v50, 4 }
 0x1f3   :  { %v477_v53 = vadd.f32 %v476_v52, %v475_v50  ;;  %1819 = vmatpush3.bf16.msra.mxu0 %v1816_v21  ;;  %v1194_v21 = vld [vmem:[%s2464_s4 + $0x100] sm:$0xff] }
 0x1f4   :  { %1821 = vmatprep.subr.bf16.mxu0 %v1820_v24  ;;  %v1856_v23 = vpack.c.bf16 %v1195_v22, %v1194_v21 }
 0x1f5   :  { %v478_v54 = vrot.slane %v477_v53, 2 }
 0x1f7   :  { %v479_v55 = vadd.f32 %v478_v54, %v477_v53  ;;  %1823 = vmatpush3.bf16.msra.mxu0 %v1820_v24  ;;  %v1196_v24 = vld [vmem:[%s2464_s4 + $0x110] sm:$0xff] }
 0x1f8   :  { %1825 = vmatprep.subr.bf16.mxu0 %v1824_v27  ;;  %v1860_v26 = vpack.c.bf16 %v1197_v25, %v1196_v24 }
 0x1f9   :  { %v480_v56 = vrot.slane %v479_v55, 1 }
 0x1fb   :  { %v481_v58 = vadd.f32 %v480_v56, %v479_v55 }
 0x1fd   :  { %1510 = vmatmul.mubr.f32.vlgmr.msra.gmra.mrb[6].mxu1 %v481_v58 }
 0x1fe   :  { %1890 = vmatpush3.bf16.msra.mxu1 %v2111_v45  ;;  %1658 = vmatprep.mubr.msk.f32.mxu1 %vm1960_vm1, %v1961_v9 }
 0x1ff   :  { %1891 = vmatprep.subr.bf16.mxu1 %v1959_v44 }
 0x202   :  { %1893 = vmatpush3.bf16.msra.mxu1 %v2130_v51 }
 0x203   :  { %1894 = vmatprep.subr.bf16.mxu1 %v1959_v44 }
 0x206   :  { %1896 = vmatpush3.bf16.msra.mxu1 %v2154_v57 }
 0x207   :  { %1897 = vmatprep.subr.bf16.mxu1 %v1959_v44 }
 0x20a   :  { %1899 = vmatpush3.bf16.msra.mxu1 %v2164_v60 }
 0x20b   :  { %1900 = vmatprep.subr.bf16.mxu1 %v1959_v44 }
 0x20e   :  { %1902 = vmatpush3.bf16.msra.mxu1 %v2174_v63 }
 0x20f   :  { %1903 = vmatprep.subr.bf16.mxu1 %v1959_v44 }
 0x212   :  { %1905 = vmatpush3.bf16.msra.mxu1 %v2184_v2 }
 0x213   :  { %1906 = vmatprep.subr.bf16.mxu1 %v1959_v44 }
 0x216   :  { %1908 = vmatpush3.bf16.msra.mxu1 %v2194_v5 }
 0x217   :  { %1909 = vmatprep.subr.bf16.mxu1 %v1959_v44 }
 0x21a   :  { %1911 = vmatpush3.bf16.msra.mxu1 %v2204_v8 }
 0x21b   :  { %1912 = vmatprep.subr.bf16.mxu1 %v1959_v44 }
 0x2d0   :  { %v548_v28 = vpop.f32.mrb[6].mxu1 }
 0x2d1   :  { %v552_v29 = vmul.f32 0.001953125, %v548_v28  ;;  %v1511_v30 = vpop.f32.mrb[7].mxu1  ;;  %v1198_v28 = vld [vmem:[%s2464_s4 + $0x120] sm:$0xff] }
 0x2d3   :  { %v553_v31 = vadd.f32 1e-05, %v552_v29  ;;  %v1199_v29 = vld [vmem:[%s2464_s4 + $0x128] sm:$0xff] }
 0x2d5   :  { %1955 = vrsqrt.f32 %v553_v31  ;;  %v1864_v31 = vpack.c.bf16 %v1199_v29, %v1198_v28  ;;  %v1210_v29 = vld [vmem:[%s2467_s5] ss:$0 sm:$0xff] }
 0x2df   :  { %v1956_v32 = vpop.eup %1955 }
 0x2e0   :  { %v558_v34 = vrot.slane %v1956_v32, %v2232_v33 }
 0x2e2   :  { %v559_v36 = vmul.f32 %v558_v34, %v2235_v38  ;;  %v560_v37 = vmul.f32 %v558_v34, %v2237_v39  ;;  %v561_v42 = vmul.f32 %v558_v34, %v2239_v40  ;;  %v562_v43 = vmul.f32 %v558_v34, %v2241_v41  ;;  %v601_v38 = vld [vmem:[%s2464_s4 + $0x10] sm:$0xff]  ;;  %v602_v39 = vld [vmem:[%s2464_s4 + $0x18] sm:$0xff] }
 0x2e3   :  { %v1828_v59 = vpack.c.bf16 %v602_v39, %v601_v38  ;;  %v1200_v34 = vld [vmem:[%s2464_s4 + $0x130] sm:$0xff] }
 0x2e4   :  { %v569_v47 = vmul.f32 %v1176_v35, %v559_v36  ;;  %v570_v48 = vmul.f32 %v1176_v35, %v560_v37  ;;  %v571_v49 = vmul.f32 %v1176_v35, %v561_v42  ;;  %v572_v50 = vmul.f32 %v1176_v35, %v562_v43  ;;  %v1201_v35 = vld [vmem:[%s2464_s4 + $0x138] sm:$0xff]  ;;  %v1202_v42 = vld [vmem:[%s2464_s4 + $0x140] sm:$0xff]  ;;  %v1203_v43 = vld [vmem:[%s2464_s4 + $0x148] sm:$0xff] }
 0x2e5   :  { %v1868_v37 = vpack.c.bf16 %v1201_v35, %v1200_v34  ;;  %v1211_v35 = vld [vmem:[%s2468_s6] ss:$0 sm:$0xff] }
 0x2e6   :  { %v579_v52 = vadd.f32 %v1177_v46, %v569_v47  ;;  %v580_v53 = vadd.f32 %v1177_v46, %v570_v48  ;;  %v581_v54 = vadd.f32 %v1177_v46, %v571_v49  ;;  %v582_v55 = vadd.f32 %v1177_v46, %v572_v50  ;;  %v1204_v47 = vld [vmem:[%s2464_s4 + $0x150] sm:$0xff]  ;;  %v1205_v48 = vld [vmem:[%s2464_s4 + $0x158] sm:$0xff]  ;;  %v1206_v50 = vld [vmem:[%s2464_s4 + $0x160] sm:$0xff] }
 0x2e7   :  { %v1872_v46 = vpack.c.bf16 %v1203_v43, %v1202_v42  ;;  %v1876_v49 = vpack.c.bf16 %v1205_v48, %v1204_v47 }
 0x2e8   :  { %v583_v40 = vmax.f32 %v579_v52, 0.0  ;;  %v584_v41 = vmax.f32 %v580_v53, 0.0  ;;  %v585_v56 = vmax.f32 %v581_v54, 0.0  ;;  %v586_v58 = vmax.f32 %v582_v55, 0.0  ;;  %v1207_v52 = vld [vmem:[%s2464_s4 + $0x168] sm:$0xff]  ;;  %v1208_v54 = vld [vmem:[%s2464_s4 + $0x170] sm:$0xff] }
 0x2e9   :  { %v1880_v53 = vpack.c.bf16 %v1207_v52, %v1206_v50  ;;  %v1209_v55 = vld [vmem:[%s2464_s4 + $0x178] sm:$0xff] }
 0x2ea   :  { %591 = vst [vmem:[#allocation2 + $0x1] sm:$0xff] %v583_v40  ;;  %592 = vst [vmem:[#allocation2 + $0x9] sm:$0xff] %v584_v41  ;;  %1544 = vmatprep.mubr.f32.mxu0 %v583_v40  ;;  %v1884_v38 = vpack.c.bf16 %v1209_v55, %v1208_v54 }
 0x2eb   :  { %593 = vst [vmem:[#allocation2 + $0x19] sm:$0xff] %v585_v56  ;;  %594 = vst [vmem:[#allocation2 + $0x21] sm:$0xff] %v586_v58  ;;  %1545 = vmatmul.mubr.f32.vlgmr.msra.gmra.mrb[4].mxu0 %v584_v41 }
 0x2ec   :  { %1827 = vmatpush3.bf16.msra.mxu0 %v1824_v27  ;;  %1547 = vmatprep.mubr.f32.mxu0 %v585_v56 }
 0x2ed   :  { %1829 = vmatprep.subr.bf16.mxu0 %v1828_v59 }
 0x2ef   :  { %1548 = vmatmul.mubr.f32.gmra.mrb[6].mxu0 %v586_v58 }
 0x2f0   :  { %1831 = vmatpush3.bf16.msra.mxu0 %v1828_v59 }
 0x2f1   :  { %v595_v4 = vld [vmem:[#allocation2] sm:$0xff]  ;;  %1833 = vmatprep.subr.bf16.mxu0 %v1832_v0  ;;  %v596_v27 = vld [vmem:[#allocation2 + $0x8] sm:$0xff] }
 0x2f2   :  { %1582 = vmatprep.mubr.f32.mxu0 %v595_v4  ;;  %v597_v30 = vld [vmem:[#allocation2 + $0x18] sm:$0xff]  ;;  %v598_v32 = vld [vmem:[#allocation2 + $0x20] sm:$0xff]  ;;  %v807_v39 = vld [vmem:[#allocation2 + $0xa] sm:$0xff] }
 0x2f3   :  { %v806_v36 = vld [vmem:[#allocation2 + $0x2] sm:$0xff]  ;;  %v808_v40 = vld [vmem:[#allocation2 + $0x1a] sm:$0xff] }
 0x2f4   :  { %1835 = vmatpush3.bf16.msra.mxu0 %v1832_v0  ;;  %v809_v41 = vld [vmem:[#allocation2 + $0x22] sm:$0xff] }
 0x2f5   :  { %1837 = vmatprep.subr.bf16.mxu0 %v1836_v6 }
 0x2f8   :  { %1839 = vmatpush3.bf16.msra.mxu0 %v1836_v6 }
 0x2f9   :  { %1841 = vmatprep.subr.bf16.mxu0 %v1840_v11 }
 0x2fc   :  { %1843 = vmatpush3.bf16.msra.mxu0 %v1840_v11 }
 0x2fd   :  { %1845 = vmatprep.subr.bf16.mxu0 %v1844_v14 }
 0x300   :  { %1847 = vmatpush3.bf16.msra.mxu0 %v1844_v14 }
 0x301   :  { %1849 = vmatprep.subr.bf16.mxu0 %v1848_v17 }
 0x304   :  { %1851 = vmatpush3.bf16.msra.mxu0 %v1848_v17 }
 0x305   :  { %1853 = vmatprep.subr.bf16.mxu0 %v1852_v20 }
 0x308   :  { %1855 = vmatpush3.bf16.msra.mxu0 %v1852_v20 }
 0x309   :  { %1857 = vmatprep.subr.bf16.mxu0 %v1856_v23 }
 0x30b   :  { %1583 = vmatmul.mubr.f32.vlgmr.msra.gmra.mrb[4].mxu0 %v596_v27 }
 0x30c   :  { %1585 = vmatprep.mubr.f32.mxu0 %v597_v30  ;;  %1859 = vmatpush3.bf16.msra.mxu0 %v1856_v23 }
 0x30d   :  { %1861 = vmatprep.subr.bf16.mxu0 %v1860_v26 }
 0x30f   :  { %1586 = vmatmul.mubr.f32.gmra.mrb[6].mxu0 %v598_v32 }
 0x310   :  { %1863 = vmatpush3.bf16.msra.mxu0 %v1860_v26  ;;  %1620 = vmatprep.mubr.f32.mxu0 %v806_v36 }
 0x311   :  { %1865 = vmatprep.subr.bf16.mxu0 %v1864_v31 }
 0x314   :  { %1867 = vmatpush3.bf16.msra.mxu0 %v1864_v31 }
 0x315   :  { %1869 = vmatprep.subr.bf16.mxu0 %v1868_v37 }
 0x318   :  { %1871 = vmatpush3.bf16.msra.mxu0 %v1868_v37 }
 0x319   :  { %1873 = vmatprep.subr.bf16.mxu0 %v1872_v46 }
 0x31c   :  { %1875 = vmatpush3.bf16.msra.mxu0 %v1872_v46 }
 0x31d   :  { %1877 = vmatprep.subr.bf16.mxu0 %v1876_v49 }
 0x320   :  { %1879 = vmatpush3.bf16.msra.mxu0 %v1876_v49 }
 0x321   :  { %1881 = vmatprep.subr.bf16.mxu0 %v1880_v53 }
 0x324   :  { %1883 = vmatpush3.bf16.msra.mxu0 %v1880_v53 }
 0x325   :  { %1885 = vmatprep.subr.bf16.mxu0 %v1884_v38 }
 0x328   :  { %1887 = vmatpush3.bf16.msra.mxu0 %v1884_v38 }
 0x32b   :  { %1621 = vmatmul.mubr.f32.vlgmr.msra.gmra.mrb[4].mxu0 %v807_v39 }
 0x32c   :  { %1623 = vmatprep.mubr.f32.mxu0 %v808_v40 }
 0x32f   :  { %1624 = vmatmul.mubr.f32.gmra.mrb[6].mxu0 %v809_v41 }
 0x3fe   :  { %v1622_v56 = vpop.f32.mrb[4].mxu0 }
 0x3ff   :  { %v893_v58 = vpop.f32.mrb[5].mxu0 }
 0x400   :  { %v934_v59 = vadd.f32 %v1622_v56, %v893_v58 }
 0x402   :  { %v1625_v61 = vpop.f32.mrb[6].mxu0 }
 0x403   :  { %v903_v62 = vpop.f32.mrb[7].mxu0 }
 0x404   :  { %v935_v0 = vadd.f32 %v934_v59, %v903_v62 }
 0x406   :  { %v936_v1 = vadd.f32 %v1625_v61, %v935_v0 }
 0x408   :  { %v937_v3 = vrot.slane %v936_v1, 4 }
 0x40a   :  { %v938_v4 = vadd.f32 %v937_v3, %v936_v1 }
 0x40c   :  { %v939_v6 = vrot.slane %v938_v4, 2 }
 0x40e   :  { %v940_v7 = vadd.f32 %v939_v6, %v938_v4 }
 0x410   :  { %v941_v10 = vrot.slane %v940_v7, 1 }
 0x412   :  { %v942_v11 = vadd.f32 %v941_v10, %v940_v7 }
 0x414   :  { %1659 = vmatmul.mubr.f32.vlgmr.msra.gmra.mrb[8].mxu1 %v942_v11 }
 0x415   :  { %1914 = vmatpush3.bf16.msra.mxu1 %v2111_v45  ;;  %1693 = vmatprep.mubr.msk.f32.mxu1 %vm1960_vm1, %v1961_v9 }
 0x416   :  { %1915 = vmatprep.subr.bf16.mxu1 %v1959_v44 }
 0x419   :  { %1917 = vmatpush3.bf16.msra.mxu1 %v2130_v51 }
 0x41a   :  { %1918 = vmatprep.subr.bf16.mxu1 %v1959_v44 }
 0x41d   :  { %1920 = vmatpush3.bf16.msra.mxu1 %v2154_v57 }
 0x41e   :  { %1921 = vmatprep.subr.bf16.mxu1 %v1959_v44 }
 0x421   :  { %1923 = vmatpush3.bf16.msra.mxu1 %v2164_v60 }
 0x422   :  { %1924 = vmatprep.subr.bf16.mxu1 %v1959_v44 }
 0x425   :  { %1926 = vmatpush3.bf16.msra.mxu1 %v2174_v63 }
 0x426   :  { %1927 = vmatprep.subr.bf16.mxu1 %v1959_v44 }
 0x429   :  { %1929 = vmatpush3.bf16.msra.mxu1 %v2184_v2 }
 0x42a   :  { %1930 = vmatprep.subr.bf16.mxu1 %v1959_v44 }
 0x42d   :  { %1932 = vmatpush3.bf16.msra.mxu1 %v2194_v5 }
 0x42e   :  { %1933 = vmatprep.subr.bf16.mxu1 %v1959_v44 }
 0x431   :  { %1935 = vmatpush3.bf16.msra.mxu1 %v2204_v8 }
 0x4e7   :  { %v1009_v45 = vpop.f32.mrb[8].mxu1 }
 0x4e8   :  { %v1013_v51 = vmul.f32 0.001953125, %v1009_v45  ;;  %v1660_v57 = vpop.f32.mrb[9].mxu1 }
 0x4ea   :  { %v1017_v60 = vrot.slane %v1013_v51, %v2232_v33 }
 0x4ec   :  { %v1018_v9 = vsub.f32 %v893_v58, %v1017_v60  ;;  %v1019_v12 = vsub.f32 %v1622_v56, %v1017_v60  ;;  %v1020_v63 = vsub.f32 %v903_v62, %v1017_v60  ;;  %v1021_v13 = vsub.f32 %v1625_v61, %v1017_v60 }
 0x4ee   :  { %v1022_v14 = vmul.f32 %v1018_v9, %v1018_v9  ;;  %v1023_v15 = vmul.f32 %v1019_v12, %v1019_v12  ;;  %v1024_v2 = vmul.f32 %v1020_v63, %v1020_v63  ;;  %v1025_v17 = vmul.f32 %v1021_v13, %v1021_v13 }
 0x4f0   :  { %v1026_v16 = vadd.f32 %v1023_v15, %v1022_v14 }
 0x4f2   :  { %v1027_v18 = vadd.f32 %v1026_v16, %v1024_v2 }
 0x4f4   :  { %v1028_v5 = vadd.f32 %v1027_v18, %v1025_v17 }
 0x4f6   :  { %v1029_v19 = vrot.slane %v1028_v5, 4 }
 0x4f8   :  { %v1030_v44 = vadd.f32 %v1029_v19, %v1028_v5 }
 0x4fa   :  { %v1031_v20 = vrot.slane %v1030_v44, 2 }
 0x4fc   :  { %v1032_v8 = vadd.f32 %v1031_v20, %v1030_v44 }
 0x4fe   :  { %v1033_v21 = vrot.slane %v1032_v8, 1 }
 0x500   :  { %v1034_v22 = vadd.f32 %v1033_v21, %v1032_v8 }
 0x502   :  { %1694 = vmatmul.mubr.f32.vlgmr.msra.gmra.mrb[10].mxu1 %v1034_v22 }
 0x5d5   :  { %v1101_v23 = vpop.f32.mrb[10].mxu1 }
 0x5d6   :  { %v1105_v24 = vmul.f32 0.001953125, %v1101_v23  ;;  %v1695_v25 = vpop.f32.mrb[11].mxu1 }
 0x5d8   :  { %v1106_v26 = vadd.f32 1e-05, %v1105_v24 }
 0x5da   :  { %1957 = vrsqrt.f32 %v1106_v26 }
 0x5e4   :  { %v1958_v27 = vpop.eup %1957 }
 0x5e5   :  { %v1111_v28 = vrot.slane %v1958_v27, %v2232_v33 }
 0x5e7   :  { %v1112_v30 = vmul.f32 %v1111_v28, %v1018_v9  ;;  %v1113_v31 = vmul.f32 %v1111_v28, %v1019_v12  ;;  %v1114_v32 = vmul.f32 %v1111_v28, %v1020_v63  ;;  %v1115_v34 = vmul.f32 %v1111_v28, %v1021_v13 }
 0x5e9   :  { %v1122_v36 = vmul.f32 %v1210_v29, %v1112_v30  ;;  %v1123_v37 = vmul.f32 %v1210_v29, %v1113_v31  ;;  %v1124_v42 = vmul.f32 %v1210_v29, %v1114_v32  ;;  %v1125_v43 = vmul.f32 %v1210_v29, %v1115_v34 }
 0x5eb   :  { %v1132_v46 = vadd.f32 %v1211_v35, %v1122_v36  ;;  %v1133_v47 = vadd.f32 %v1211_v35, %v1123_v37  ;;  %v1134_v48 = vadd.f32 %v1211_v35, %v1124_v42  ;;  %v1135_v33 = vadd.f32 %v1211_v35, %v1125_v43 }
 0x5ed   :  { %v1136_v49 = vmax.f32 %v1132_v46, 0.0  ;;  %v1137_v50 = vmax.f32 %v1133_v47, 0.0  ;;  %v1138_v52 = vmax.f32 %v1134_v48, 0.0  ;;  %v1139_v53 = vmax.f32 %v1135_v33, 0.0 }
 0x5ef   :  { %1140 = vst [vmem:[%s2469_s8] sm:$0xff] %v1136_v49  ;;  %1141 = vst [vmem:[%s2469_s8 + $0x8] sm:$0xff] %v1137_v50 }
 0x5f0   :  { %1142 = vst [vmem:[%s2469_s8 + $0x10] sm:$0xff] %v1138_v52  ;;  %1143 = vst [vmem:[%s2469_s8 + $0x18] sm:$0xff] %v1139_v53 }

</bundles_post_ra>
